<compile_context>
chip_gen: v7x
topology: tpu7x:2x2x1
jax: 0.10.0
libtpu: 0.0.40
codegen_flags: <defaults>
</compile_context>

<pallas_src>
import math
import jax
import jax.numpy as jnp
from jax.experimental import pallas as pl
from jax.experimental.pallas import tpu as pltpu


def _proto_dist_kernel(x_ref, pneg2_ref, p2_ref, o_ref):
    """Single grid step, all groups resident in VMEM.

    x_ref:     (G, B, D)     f32   group-stacked activations
    pneg2_ref: (G, N_pad, D) bf16  prototypes pre-scaled by -2 (zero-padded rows)
    p2_ref:    (G, 1, N_pad) f32   precomputed ||p||^2 (zeros in padding)
    o_ref:     (G, B, N_pad) f32   squared distances, lane-dense last dim
    """
    x = x_ref[...]                                            # (G, B, D) f32
    # ||x||^2 stays in f32 (cancellation-sensitive term).
    x2 = jnp.sum(x * x, axis=-1, keepdims=True)               # (G, B, 1)
    # -2 * x . p^T on the MXU: bf16 inputs, f32 accumulate, batch dim = group.
    xp = jnp.einsum(
        'gbd,gnd->gbn',
        x.astype(jnp.bfloat16), pneg2_ref[...],
        preferred_element_type=jnp.float32)                   # (G, B, N_pad)
    # Epilogue: two VPU adds, fully hidden under the MXU drain.
    o_ref[...] = (x2 + p2_ref[...]) + xp


def fused_proto_sqdist(x_stacked, protos_neg2_bf16, p2_stacked):
    """x_stacked: (G,B,D) f32; protos_neg2_bf16: (G,N_pad,D) bf16; p2: (G,1,N_pad) f32."""
    G, B, D = x_stacked.shape
    _, N_pad, _ = protos_neg2_bf16.shape
    cost = pl.CostEstimate(
        flops=2 * G * B * N_pad * D + 2 * G * B * D,
        transcendentals=0,
        bytes_accessed=(4 * G * B * D + 2 * G * N_pad * D
                        + 4 * G * N_pad + 4 * G * B * N_pad),
    )
    return pl.pallas_call(
        _proto_dist_kernel,
        out_shape=jax.ShapeDtypeStruct((G, B, N_pad), jnp.float32),
        grid=(1,),
        in_specs=[
            pl.BlockSpec((G, B, D), lambda i: (0, 0, 0)),
            pl.BlockSpec((G, N_pad, D), lambda i: (0, 0, 0)),
            pl.BlockSpec((G, 1, N_pad), lambda i: (0, 0, 0)),
        ],
        out_specs=pl.BlockSpec((G, B, N_pad), lambda i: (0, 0, 0)),
        compiler_params=pltpu.CompilerParams(
            dimension_semantics=("arbitrary",)),
        cost_estimate=cost,
    )(x_stacked, protos_neg2_bf16, p2_stacked)


def xavier_uniform(key, shape, gain=1.0, dtype=jnp.float32):
    """Matches torch.nn.init.xavier_uniform_ for a 2D (fan_out, fan_in) tensor."""
    fan_out, fan_in = shape
    limit = gain * math.sqrt(6.0 / (fan_in + fan_out))
    return jax.random.uniform(key, shape, dtype=dtype, minval=-limit, maxval=limit)


def _round_up(v, m):
    return ((v + m - 1) // m) * m


class PrototypeLayerPallas:
    def __init__(self, input_dim=10, n_proto_vecs=(10,), key=None):
        self.n_proto_vecs = tuple(n_proto_vecs)
        self.n_proto_groups = len(n_proto_vecs)
        self.input_dim = input_dim
        if key is None:
            key = jax.random.PRNGKey(0)
        keys = jax.random.split(key, self.n_proto_groups)

        # Per-group parameters (xavier_uniform like the torch init), kept f32.
        self.proto_vecs = [
            xavier_uniform(keys[k], (self.n_proto_vecs[k], input_dim))
            for k in range(self.n_proto_groups)
        ]

        # ---- Fused / padded buffers built ONCE at init ----------------------
        G = self.n_proto_groups
        self.n_pad = max(128, _round_up(max(self.n_proto_vecs), 128))
        protos_neg2 = jnp.zeros((G, self.n_pad, input_dim), dtype=jnp.float32)
        p2_stacked = jnp.zeros((G, 1, self.n_pad), dtype=jnp.float32)
        for k in range(G):
            n_k = self.n_proto_vecs[k]
            # -2 folded into the stored prototypes; padded rows stay zero.
            protos_neg2 = protos_neg2.at[k, :n_k, :].set(-2.0 * self.proto_vecs[k])
            p2_k = jnp.sum(self.proto_vecs[k] * self.proto_vecs[k], axis=-1)
            p2_stacked = p2_stacked.at[k, 0, :n_k].set(p2_k)
        # bf16 copy for the MXU cross-term (cast off the forward path).
        self.protos_neg2_bf16 = protos_neg2.astype(jnp.bfloat16)  # (G, N_pad, D)
        self.p2_stacked = p2_stacked                               # (G, 1, N_pad) f32

        # Whole forward path under one jit (shapes static).
        n_vecs = self.n_proto_vecs

        def _forward(x_tuple, protos_neg2_bf16, p2):
            x_stacked = jnp.stack(
                [xi.astype(jnp.float32) for xi in x_tuple], axis=0)     # (G, B, D)
            out_padded = fused_proto_sqdist(x_stacked, protos_neg2_bf16, p2)
            # Slice off padded prototype columns per group (static sizes).
            return tuple(out_padded[k, :, :n_vecs[k]] for k in range(G))

        self._forward = jax.jit(_forward)

    def __call__(self, x):
        # x: dict/list indexed by group id 0..G-1, each entry (B, input_dim)
        G = self.n_proto_groups
        x_tuple = tuple(x[k] for k in range(G))
        outs = self._forward(x_tuple, self.protos_neg2_bf16, self.p2_stacked)
        return {k: outs[k] for k in range(G)}


def _reference_sqdist(x, p):
    # Pure-JAX f32 reference of list_of_distances: ||x||^2 - 2 x p^T + ||p||^2
    x2 = jnp.sum(x * x, axis=-1, keepdims=True)
    p2 = jnp.sum(p * p, axis=-1, keepdims=True).T
    return x2 - 2.0 * jnp.dot(x, p.T) + p2


if __name__ == "__main__":
    key = jax.random.PRNGKey(0)
    k_params, k_x0, k_x1 = jax.random.split(key, 3)

    input_dim = 32
    n_proto_vecs = (10, 12)
    batch = 8

    layer = PrototypeLayerPallas(input_dim=input_dim, n_proto_vecs=n_proto_vecs,
                                 key=k_params)

    x = {
        0: jax.random.normal(k_x0, (batch, input_dim), dtype=jnp.float32),
        1: jax.random.normal(k_x1, (batch, input_dim), dtype=jnp.float32),
    }

    out = layer(x)
    for k in out:
        jax.block_until_ready(out[k])

    # Correctness check against pure-JAX f32 reference (bf16 cross-term ->
    # slightly loosened tolerance; distances here are O(30)).
    for k in range(len(n_proto_vecs)):
        ref = _reference_sqdist(x[k], layer.proto_vecs[k])
        assert out[k].shape == (batch, n_proto_vecs[k])
        assert jnp.allclose(out[k], ref, atol=1e-1, rtol=1e-2), (
            f"group {k}: max abs err {jnp.max(jnp.abs(out[k] - ref))}")

    print("KERNEL_OK")
</pallas_src>

<mosaic_0001>
module attributes {stable_mosaic.version = 11 : i64} {
  func.func @_proto_dist_kernel(%arg0: i32, %arg1: memref<2x8x32xf32, #tpu.memory_space<vmem>>, %arg2: memref<2x128x32xbf16, #tpu.memory_space<vmem>>, %arg3: memref<2x1x128xf32, #tpu.memory_space<vmem>>, %arg4: memref<2x8x128xf32, #tpu.memory_space<vmem>>) attributes {dimension_semantics = [#tpu.dimension_semantics<arbitrary>], iteration_bounds = array<i64: 1>, scalar_prefetch = 0 : i64, scratch_operands = 0 : i64, tpu.core_type = #tpu.core_type<tc>, window_params = [{pipeline_mode = #tpu.pipeline_mode<synchronous>, transform_indices = @transform_0, window_bounds = array<i64: 2, 8, 32>}, {pipeline_mode = #tpu.pipeline_mode<synchronous>, transform_indices = @transform_1, window_bounds = array<i64: 2, 128, 32>}, {pipeline_mode = #tpu.pipeline_mode<synchronous>, transform_indices = @transform_2, window_bounds = array<i64: 2, 1, 128>}, {pipeline_mode = #tpu.pipeline_mode<synchronous>, transform_indices = @transform_3, window_bounds = array<i64: 2, 8, 128>}]} {
    %c0 = arith.constant 0 : index
    %c0_0 = arith.constant 0 : index
    %c0_1 = arith.constant 0 : index
    %0 = vector.load %arg1[%c0, %c0_0, %c0_1] : memref<2x8x32xf32, #tpu.memory_space<vmem>>, vector<2x8x32xf32>
    %1 = arith.mulf %0, %0 : vector<2x8x32xf32>
    %cst = arith.constant dense<0.000000e+00> : vector<2x8xf32>
    %2 = vector.multi_reduction <add>, %1, %cst [2] : vector<2x8x32xf32> to vector<2x8xf32>
    %3 = vector.shape_cast %2 : vector<2x8xf32> to vector<2x8x1xf32>
    %4 = arith.truncf %0 : vector<2x8x32xf32> to vector<2x8x32xbf16>
    %c0_2 = arith.constant 0 : index
    %c0_3 = arith.constant 0 : index
    %c0_4 = arith.constant 0 : index
    %5 = vector.load %arg2[%c0_2, %c0_3, %c0_4] : memref<2x128x32xbf16, #tpu.memory_space<vmem>>, vector<2x128x32xbf16>
    "tpu.trace_start"() <{level = 10 : i32, message = "gbd,gnd->gbn"}> : () -> ()
    %cst_5 = arith.constant dense<0.000000e+00> : vector<2x8x128xf32>
    %6 = tpu.matmul %4, %5, %cst_5 {dimension_numbers = #tpu.dot_dimension_numbers<[2], [2], [1], [1], [0, 0, 0, 1, 1, 1], [0], [0]>} : vector<2x8x32xbf16>, vector<2x128x32xbf16>, vector<2x8x128xf32> -> vector<2x8x128xf32>
    "tpu.trace_stop"() : () -> ()
    %c0_6 = arith.constant 0 : index
    %c0_7 = arith.constant 0 : index
    %c0_8 = arith.constant 0 : index
    %7 = vector.load %arg3[%c0_6, %c0_7, %c0_8] : memref<2x1x128xf32, #tpu.memory_space<vmem>>, vector<2x1x128xf32>
    %8 = vector.broadcast %3 : vector<2x8x1xf32> to vector<2x8x128xf32>
    %9 = vector.broadcast %7 : vector<2x1x128xf32> to vector<2x8x128xf32>
    %10 = arith.addf %8, %9 : vector<2x8x128xf32>
    %11 = arith.addf %10, %6 : vector<2x8x128xf32>
    %c0_9 = arith.constant 0 : index
    %c0_10 = arith.constant 0 : index
    %c0_11 = arith.constant 0 : index
    %12 = vector.load %arg4[%c0_9, %c0_10, %c0_11] : memref<2x8x128xf32, #tpu.memory_space<vmem>>, vector<2x8x128xf32>
    tpu.vector_store %arg4[%c0_9, %c0_10, %c0_11], %11 {strides = array<i32>} : memref<2x8x128xf32, #tpu.memory_space<vmem>>, vector<2x8x128xf32>,
    return
  }
  func.func @transform_0(%arg0: i32) -> (i32, i32, i32) {
    %c0_i32 = arith.constant 0 : i32
    %c0_i32_0 = arith.constant 0 : i32
    %c0_i32_1 = arith.constant 0 : i32
    %c0_i32_2 = arith.constant 0 : i32
    return %c0_i32, %c0_i32_0, %c0_i32_1 : i32, i32, i32
  }
  func.func @transform_1(%arg0: i32) -> (i32, i32, i32) {
    %c0_i32 = arith.constant 0 : i32
    %c0_i32_0 = arith.constant 0 : i32
    %c0_i32_1 = arith.constant 0 : i32
    %c0_i32_2 = arith.constant 0 : i32
    return %c0_i32, %c0_i32_0, %c0_i32_1 : i32, i32, i32
  }
  func.func @transform_2(%arg0: i32) -> (i32, i32, i32) {
    %c0_i32 = arith.constant 0 : i32
    %c0_i32_0 = arith.constant 0 : i32
    %c0_i32_1 = arith.constant 0 : i32
    %c0_i32_2 = arith.constant 0 : i32
    return %c0_i32, %c0_i32_0, %c0_i32_1 : i32, i32, i32
  }
  func.func @transform_3(%arg0: i32) -> (i32, i32, i32) {
    %c0_i32 = arith.constant 0 : i32
    %c0_i32_0 = arith.constant 0 : i32
    %c0_i32_1 = arith.constant 0 : i32
    %c0_i32_2 = arith.constant 0 : i32
    return %c0_i32, %c0_i32_0, %c0_i32_1 : i32, i32, i32
  }
}

</mosaic_0001>

<bundles_post_ra>
// kernel: _forward.1
= control target key start
LH: loop header
LB: loop body
LE: loop exit
PB: predicated region body
PF: predicated region fallthrough
CT: control target
= control target key end

     0   :  { %vm19_vm0 = vcmask 261120   ;;  %v394_v0 = vmov 0.0   ;;  %vm395_vm1 = vmmov 0   ;;  %s520_s1 = inlined_call_operand.vmem [shape: bf16[2,128,32], index: 1, kind: input, shape index: {}]   ;;  %s521_s0 = inlined_call_operand.vmem [shape: f32[2,8,32], index: 0, kind: input, shape index: {}]   ;;  %s522_s2 = inlined_call_operand.vmem [shape: f32[2,1,128], index: 2, kind: input, shape index: {}]   ;;  %s523_s3 = inlined_call_operand.vmem [shape: f32[2,8,128], index: 3, kind: output, shape index: {}]  }
   0x1   :  { %336 = vmatprep.subr.bf16.mxu0 %v394_v0  ;;  %356 = vmatprep.subr.bf16.mxu1 %v394_v0  ;;  %v378_v1 = vld [vmem:[%s520_s1] sm:$0xff]   ;;  %v380_v5 = vld [vmem:[%s520_s1 + $0x8] sm:$0xff]   ;;  %v382_v9 = vld [vmem:[%s520_s1 + $0x10] sm:$0xff]  }
   0x2   :  { %v379_v2 = vld [vmem:[%s520_s1 + $0x40] sm:$0xff]   ;;  %352 = vmatprep.mubr.msk.bf16.mxu0 %vm395_vm1, %v394_v0  ;;  %372 = vmatprep.mubr.msk.bf16.mxu1 %vm395_vm1, %v394_v0  ;;  %v104_v3 = vsel %vm19_vm0, %v378_v1, 0  ;;  %v381_v6 = vld [vmem:[%s520_s1 + $0x48] sm:$0xff]   ;;  %v107_v7 = vsel %vm19_vm0, %v380_v5, 0  ;;  %v383_v10 = vld [vmem:[%s520_s1 + $0x50] sm:$0xff]   ;;  %v110_v11 = vsel %vm19_vm0, %v382_v9, 0 }
   0x3   :  { %337 = vmatpush3.bf16.xpose.msra.mxu0 %v104_v3  ;;  %v211_v4 = vsel %vm19_vm0, %v379_v2, 0  ;;  %v214_v8 = vsel %vm19_vm0, %v381_v6, 0  ;;  %v15_v12 = vld [vmem:[%s521_s0] sm:$0xff]  ;;  %v217_v13 = vsel %vm19_vm0, %v383_v10, 0  ;;  %v16_v14 = vld [vmem:[%s521_s0 + $0x8] sm:$0xff]  ;;  %v384_v18 = vld [vmem:[%s520_s1 + $0x18] sm:$0xff]  }
   0x4   :  { %357 = vmatpush3.bf16.xpose.msra.mxu1 %v211_v4  ;;  %338 = vmatprep.subr.bf16.mxu0 %v394_v0  ;;  %v17_v15 = vmul.f32 %v15_v12, %v15_v12  ;;  %v18_v16 = vmul.f32 %v16_v14, %v16_v14  ;;  %v385_v19 = vld [vmem:[%s520_s1 + $0x58] sm:$0xff]   ;;  %v113_v21 = vsel %vm19_vm0, %v384_v18, 0  ;;  %v386_v23 = vld [vmem:[%s520_s1 + $0x20] sm:$0xff]   ;;  %v388_v27 = vld [vmem:[%s520_s1 + $0x28] sm:$0xff]   ;;  %v26_v39 = vpack.c.bf16 %v15_v12, %v15_v12 }
   0x5   :  { %358 = vmatprep.subr.bf16.mxu1 %v394_v0  ;;  %v220_v22 = vsel %vm19_vm0, %v385_v19, 0  ;;  %v387_v24 = vld [vmem:[%s520_s1 + $0x60] sm:$0xff]   ;;  %v116_v25 = vsel %vm19_vm0, %v386_v23, 0  ;;  %v389_v28 = vld [vmem:[%s520_s1 + $0x68] sm:$0xff]   ;;  %v119_v29 = vsel %vm19_vm0, %v388_v27, 0  ;;  %v390_v31 = vld [vmem:[%s520_s1 + $0x30] sm:$0xff]   ;;  %v27_v40 = vpack.c.bf16 %v16_v14, %v16_v14 }
   0x6   :  { %v20_v17 = vsel %vm19_vm0, %v17_v15, 0.0  ;;  %v23_v20 = vsel %vm19_vm0, %v18_v16, 0.0  ;;  %v223_v26 = vsel %vm19_vm0, %v387_v24, 0  ;;  %v226_v30 = vsel %vm19_vm0, %v389_v28, 0  ;;  %v391_v32 = vld [vmem:[%s520_s1 + $0x70] sm:$0xff]   ;;  %v392_v35 = vld [vmem:[%s520_s1 + $0x38] sm:$0xff]  }
   0x7   :  { %21 = vadd.xlane.f32.xlu0 %v20_v17  ;;  %v122_v33 = vsel %vm19_vm0, %v390_v31, 0  ;;  %v229_v34 = vsel %vm19_vm0, %v391_v32, 0  ;;  %v393_v36 = vld [vmem:[%s520_s1 + $0x78] sm:$0xff]   ;;  %v125_v37 = vsel %vm19_vm0, %v392_v35, 0  ;;  %v317_v42 = vld [vmem:[%s522_s2 + $0x1] ss:$0 sm:$0xff] }
   0x8   :  { %v232_v38 = vsel %vm19_vm0, %v393_v36, 0  ;;  %v316_v44 = vld [vmem:[%s522_s2] ss:$0 sm:$0xff] }
   0xb   :  { %339 = vmatpush3.bf16.xpose.msra.mxu0 %v107_v7  ;;  %24 = vadd.xlane.f32.xlu0 %v23_v20 }
   0xc   :  { %359 = vmatpush3.bf16.xpose.msra.mxu1 %v214_v8  ;;  %340 = vmatprep.subr.bf16.mxu0 %v394_v0 }
   0xd   :  { %360 = vmatprep.subr.bf16.mxu1 %v394_v0 }
  0x13   :  { %341 = vmatpush3.bf16.xpose.msra.mxu0 %v110_v11 }
  0x14   :  { %361 = vmatpush3.bf16.xpose.msra.mxu1 %v217_v13  ;;  %342 = vmatprep.subr.bf16.mxu0 %v394_v0 }
  0x15   :  { %362 = vmatprep.subr.bf16.mxu1 %v394_v0 }
  0x1b   :  { %343 = vmatpush3.bf16.xpose.msra.mxu0 %v113_v21 }
  0x1c   :  { %363 = vmatpush3.bf16.xpose.msra.mxu1 %v220_v22  ;;  %344 = vmatprep.subr.bf16.mxu0 %v394_v0 }
  0x1d   :  { %364 = vmatprep.subr.bf16.mxu1 %v394_v0 }
  0x23   :  { %345 = vmatpush3.bf16.xpose.msra.mxu0 %v116_v25 }
  0x24   :  { %365 = vmatpush3.bf16.xpose.msra.mxu1 %v223_v26  ;;  %346 = vmatprep.subr.bf16.mxu0 %v394_v0 }
  0x25   :  { %366 = vmatprep.subr.bf16.mxu1 %v394_v0 }
  0x2b   :  { %347 = vmatpush3.bf16.xpose.msra.mxu0 %v119_v29 }
  0x2c   :  { %367 = vmatpush3.bf16.xpose.msra.mxu1 %v226_v30  ;;  %348 = vmatprep.subr.bf16.mxu0 %v394_v0 }
  0x2d   :  { %368 = vmatprep.subr.bf16.mxu1 %v394_v0 }
  0x33   :  { %349 = vmatpush3.bf16.xpose.msra.mxu0 %v122_v33 }
  0x34   :  { %369 = vmatpush3.bf16.xpose.msra.mxu1 %v229_v34  ;;  %350 = vmatprep.subr.bf16.mxu0 %v394_v0 }
  0x35   :  { %370 = vmatprep.subr.bf16.mxu1 %v394_v0 }
  0x3b   :  { %351 = vmatpush3.bf16.xpose.msra.mxu0 %v125_v37 }
  0x3c   :  { %371 = vmatpush3.bf16.xpose.msra.mxu1 %v232_v38 }
  0x42   :  { %353 = vmatmul.mubr.msk.bf16.vlgmr.msra.gmra.mrb[0].mxu0 %vm19_vm0, %v26_v39 }
  0x43   :  { %373 = vmatmul.mubr.msk.bf16.vlgmr.msra.gmra.mrb[0].mxu1 %vm19_vm0, %v27_v40 }
  0x94   :  { %v22_v41 = vpop.xlane.xlu0 %21 }
  0x95   :  { %v288_v46 = vadd.f32 %v316_v44, %v22_v41 }
  0x98   :  { %v25_v43 = vpop.xlane.xlu0 %24 }
  0x99   :  { %v289_v45 = vadd.f32 %v317_v42, %v25_v43 }
 0x115   :  { %v161_v47 = vpop.f32.mrb[0].mxu0 }
 0x116   :  { %v290_v48 = vadd.f32 %v288_v46, %v161_v47  ;;  %v268_v49 = vpop.f32.mrb[0].mxu1  ;;  %v354_v50 = vpop.f32.mrb[1].mxu0 }
 0x117   :  { %v291_v51 = vadd.f32 %v289_v45, %v268_v49  ;;  %v374_v52 = vpop.f32.mrb[1].mxu1  ;;  %v164_v53 = vpop.f32.mrb[2].mxu0 }
 0x118   :  { %292 = vst [vmem:[%s523_s3] sm:$0xff] %v290_v48  ;;  %v271_v54 = vpop.f32.mrb[2].mxu1  ;;  %v355_v55 = vpop.f32.mrb[3].mxu0 }
 0x119   :  { %293 = vst [vmem:[%s523_s3 + $0x8] sm:$0xff] %v291_v51  ;;  %v375_v56 = vpop.f32.mrb[3].mxu1 }

</bundles_post_ra>
